<compile_context>
chip_gen: v7x
topology: tpu7x:2x2x1
jax: 0.10.0
libtpu: 0.0.40
codegen_flags: <defaults>
</compile_context>

<pallas_src>
import jax
import jax.numpy as jnp
from jax.experimental import pallas as pl
from jax.experimental.pallas import tpu as pltpu

SCALE_FACTOR = 1.8467055342154763

_LANES = 128
_MIN_STEPS = 8                  # >=8 grid steps: pipelining + both v7x TCs busy
_SINGLE_BLOCK_BYTES = 1 << 20   # below this, one full-extent block is cheapest
_DEFAULT_BLOCK_BYTES = 8 << 20  # ~8 MiB blocks: per-step overhead <= a few %
_VMEM_FALLBACK_CAP = 56 << 20   # safe on every generation (v7x has 64 MiB VMEM)


def _make_kernel(compute_dtype):
    half_scale = 0.5 * SCALE_FACTOR

    def kernel(x_ref, o_ref):
        # sigmoid(x) * s == 0.5*s + 0.5*s*tanh(0.5*x):
        # one EUP transcendental per element; mul/add stay on the VPU.
        x = x_ref[...].astype(compute_dtype)
        t = jnp.tanh(0.5 * x)
        o_ref[...] = (half_scale * t + half_scale).astype(o_ref.dtype)

    return kernel


def _sublane_multiple(dtype) -> int:
    # f32 -> 8, bf16/f16 -> 16, int8/fp8 -> 32 sublane packing.
    return {4: 8, 2: 16, 1: 32}.get(jnp.dtype(dtype).itemsize, 8)


def _round_up(x: int, m: int) -> int:
    return ((x + m - 1) // m) * m


def _bf16_compute_ok() -> bool:
    # v6e/v7x have bf16 VPU+EUP; v5e and older do not -> keep the f32 upcast.
    # (A VPU-only minimax sigmoid would be the v5e-bf16 option if ever needed.)
    try:
        kind = jax.devices()[0].device_kind.lower()
    except Exception:
        return False
    return not any(v in kind for v in ("v2", "v3", "v4", "v5"))


def _vmem_limit(block_nbytes: int) -> int:
    # 1 input + 1 output, double-buffered each, plus headroom; capped below
    # physical VMEM (generation-aware) so big blocks stay legal on v7x.
    try:
        cap = int(pltpu.get_tpu_info().vmem_capacity_bytes) - (8 << 20)
    except Exception:
        cap = _VMEM_FALLBACK_CAP
    cap = max(16 << 20, cap)
    return min(cap, max(16 << 20, 6 * block_nbytes))


def _compiler_params(block_nbytes: int) -> pltpu.CompilerParams:
    return pltpu.CompilerParams(
        dimension_semantics=("parallel",),
        vmem_limit_bytes=_vmem_limit(block_nbytes),
    )


def scaled_sigmoid(
    x: jax.Array,
    *,
    block_bytes: int = _DEFAULT_BLOCK_BYTES,
    donate_input: bool = False,
) -> jax.Array:
    """Applies sigmoid(x) * 1.8467... elementwise via a Pallas TPU kernel."""
    orig_shape = x.shape
    dtype = x.dtype
    n_elems = x.size
    if n_elems == 0:
        return x

    itemsize = jnp.dtype(dtype).itemsize
    sublane = _sublane_multiple(dtype)
    row_bytes = _LANES * itemsize

    compute_dtype = (
        jnp.bfloat16 if (dtype == jnp.bfloat16 and _bf16_compute_ok()) else jnp.float32
    )
    kernel = _make_kernel(compute_dtype)

    # Optional in-place HBM buffer reuse (only when the caller donates x).
    io_alias = {0: 0} if donate_input else {}

    x_flat = jnp.ravel(x)  # metadata-only for contiguous layouts

    target_rows = max(sublane, block_bytes // row_bytes)
    target_rows -= target_rows % sublane

    if n_elems % _LANES == 0:
        # ---- fast path: lane-dense (rows, 128) slab, no pad / slice ------
        rows = n_elems // _LANES
        x2d = x_flat.reshape(rows, _LANES)

        if rows * row_bytes <= _SINGLE_BLOCK_BYTES:
            block_rows = rows          # full-extent block is always legal
        else:
            # >= _MIN_STEPS steps: DMAs pipeline and both v7x TCs get work.
            min_step_rows = _round_up(pl.cdiv(rows, _MIN_STEPS), sublane)
            block_rows = max(sublane, min(target_rows, min_step_rows))
        grid = (pl.cdiv(rows, block_rows),)
        block_nbytes = block_rows * row_bytes

        out2d = pl.pallas_call(
            kernel,
            out_shape=jax.ShapeDtypeStruct((rows, _LANES), dtype),
            grid_spec=pltpu.PrefetchScalarGridSpec(
                num_scalar_prefetch=0,
                grid=grid,
                in_specs=[pl.BlockSpec((block_rows, _LANES), lambda i: (i, 0))],
                out_specs=pl.BlockSpec((block_rows, _LANES), lambda i: (i, 0)),
            ),
            compiler_params=_compiler_params(block_nbytes),
            input_output_aliases=io_alias,
        )(x2d)
        return out2d.reshape(orig_shape)

    # ---- non-128-aligned: 1-D flat stream, Pallas masks the ragged tail ----
    lane_chunk = sublane * _LANES
    if n_elems * itemsize <= _SINGLE_BLOCK_BYTES:
        block_elems = n_elems          # full-extent block is always legal
    else:
        min_step_elems = _round_up(pl.cdiv(n_elems, _MIN_STEPS), lane_chunk)
        block_elems = max(lane_chunk, min(target_rows * _LANES, min_step_elems))
    grid = (pl.cdiv(n_elems, block_elems),)
    block_nbytes = block_elems * itemsize

    out_flat = pl.pallas_call(
        kernel,
        out_shape=jax.ShapeDtypeStruct((n_elems,), dtype),
        grid_spec=pltpu.PrefetchScalarGridSpec(
            num_scalar_prefetch=0,
            grid=grid,
            in_specs=[pl.BlockSpec((block_elems,), lambda i: (i,))],
            out_specs=pl.BlockSpec((block_elems,), lambda i: (i,)),
        ),
        compiler_params=_compiler_params(block_nbytes),
        input_output_aliases=io_alias,
    )(x_flat)
    return out_flat.reshape(orig_shape)


if __name__ == "__main__":
    key = jax.random.PRNGKey(0)
    k0, k1, k2, k3 = jax.random.split(key, 4)

    def ref_fn(v):
        return (jax.nn.sigmoid(v.astype(jnp.float32)) * SCALE_FACTOR).astype(v.dtype)

    # 1) Module-spec shape: NCHW (2, 4, 16, 16), f32 -> aligned (rows,128) path.
    x = jax.random.normal(k0, (2, 4, 16, 16), dtype=jnp.float32)
    out = jax.block_until_ready(scaled_sigmoid(x))
    assert out.shape == x.shape and out.dtype == x.dtype
    assert jnp.allclose(out, ref_fn(x), atol=1e-5, rtol=1e-5)

    # 2) Non-128-aligned element count -> 1-D masked-tail path (no pad/slice).
    x_odd = jax.random.normal(k1, (3, 7, 11), dtype=jnp.float32)
    out_odd = jax.block_until_ready(scaled_sigmoid(x_odd))
    assert out_odd.shape == x_odd.shape and out_odd.dtype == x_odd.dtype
    assert jnp.allclose(out_odd, ref_fn(x_odd), atol=1e-5, rtol=1e-5)

    # 3) Aligned multi-step pipelined grid (2 MiB), plus a forced ragged tail.
    x_big = jax.random.normal(k2, (8, 4, 128, 128), dtype=jnp.float32)
    out_big = jax.block_until_ready(scaled_sigmoid(x_big))
    assert jnp.allclose(out_big, ref_fn(x_big), atol=1e-5, rtol=1e-5)
    out_ragged = jax.block_until_ready(scaled_sigmoid(x_big, block_bytes=96 * 1024))
    assert jnp.allclose(out_ragged, ref_fn(x_big), atol=1e-5, rtol=1e-5)

    # 3b) Unaligned AND multi-step -> 1-D path with masked ragged last block.
    x_unal = jax.random.normal(k2, (1000, 17, 31), dtype=jnp.float32)
    out_unal = jax.block_until_ready(scaled_sigmoid(x_unal))
    assert jnp.allclose(out_unal, ref_fn(x_unal), atol=1e-5, rtol=1e-5)

    # 4) bf16: native bf16 tanh on v6e/v7x, f32 upcast on v5e.
    x_bf = jax.random.normal(k3, (2, 4, 16, 16), dtype=jnp.bfloat16)
    out_bf = jax.block_until_ready(scaled_sigmoid(x_bf))
    assert out_bf.shape == x_bf.shape and out_bf.dtype == jnp.bfloat16
    assert jnp.allclose(
        out_bf.astype(jnp.float32), ref_fn(x_bf).astype(jnp.float32),
        atol=3e-2, rtol=3e-2,
    )

    print("KERNEL_OK")
</pallas_src>

<mosaic_0001>
module attributes {stable_mosaic.version = 11 : i64} {
  func.func @kernel(%arg0: i32, %arg1: memref<16x128xf32, #tpu.memory_space<vmem>>, %arg2: memref<16x128xf32, #tpu.memory_space<vmem>>) attributes {dimension_semantics = [#tpu.dimension_semantics<parallel>], iteration_bounds = array<i64: 1>, scalar_prefetch = 0 : i64, scratch_operands = 0 : i64, tpu.core_type = #tpu.core_type<tc>, window_params = [{transform_indices = @transform_0, window_bounds = array<i64: 16, 128>}, {transform_indices = @transform_1, window_bounds = array<i64: 16, 128>}]} {
    %c0 = arith.constant 0 : index
    %c0_0 = arith.constant 0 : index
    %0 = vector.load %arg1[%c0, %c0_0] : memref<16x128xf32, #tpu.memory_space<vmem>>, vector<16x128xf32>
    %cst = arith.constant 5.000000e-01 : f32
    %1 = vector.broadcast %cst : f32 to vector<16x128xf32>
    %2 = arith.mulf %1, %0 : vector<16x128xf32>
    %3 = math.tanh %2 : vector<16x128xf32>
    %cst_1 = arith.constant 0.923352777 : f32
    %4 = vector.broadcast %cst_1 : f32 to vector<16x128xf32>
    %5 = arith.mulf %4, %3 : vector<16x128xf32>
    %cst_2 = arith.constant 0.923352777 : f32
    %6 = vector.broadcast %cst_2 : f32 to vector<16x128xf32>
    %7 = arith.addf %5, %6 : vector<16x128xf32>
    %c0_3 = arith.constant 0 : index
    %c0_4 = arith.constant 0 : index
    %8 = vector.load %arg2[%c0_3, %c0_4] : memref<16x128xf32, #tpu.memory_space<vmem>>, vector<16x128xf32>
    tpu.vector_store %arg2[%c0_3, %c0_4], %7 {strides = array<i32>} : memref<16x128xf32, #tpu.memory_space<vmem>>, vector<16x128xf32>,
    return
  }
  func.func @transform_0(%arg0: i32) -> (i32, i32) {
    %c0_i32 = arith.constant 0 : i32
    %c0_i32_0 = arith.constant 0 : i32
    return %arg0, %c0_i32 : i32, i32
  }
  func.func @transform_1(%arg0: i32) -> (i32, i32) {
    %c0_i32 = arith.constant 0 : i32
    %c0_i32_0 = arith.constant 0 : i32
    return %arg0, %c0_i32 : i32, i32
  }
}

</mosaic_0001>

<bundles_post_ra>
// kernel: tpu_custom_call.1
= control target key start
LH: loop header
LB: loop body
LE: loop exit
PB: predicated region body
PF: predicated region fallthrough
CT: control target
= control target key end

     0   :  { %6 = vsyncpa [#allocation3], 0  ;;  %s152_s0 = inlined_call_operand.hbm [shape: f32[16,128], index: 0, kind: input, shape index: {}]   ;;  %s153_s1 = inlined_call_operand.hbm [shape: f32[16,128], index: 1, kind: output, shape index: {}]  }
   0x1   :  { %7 = vsyncpa [#allocation4], 0  ;;  %s108_s6 = smov [#allocation2]   ;;  %s60_s10 = scalar_lea.hbm %s152_s0, 256 }
   0x2   :  { %s13_s7 = sshll.u32 %s108_s6, 4  ;;  %p61_p0 = scmp.ne.s32.totalorder %s152_s0, %s60_s10  ;;  %s14_s7 = int_to_ptr.vmem [resolvable:$true] %s13_s7 }
   0x3   :  { %p64_p1 = scmp.lt.u32.totalorder %s60_s10, %s152_s0 }
   0x5   :  { %p66_p2 = pnand %p64_p1, %p61_p0 }
   0x7   :  { %69 = shalt.err (!%p66_p2)
}
   0x8   :  { %s70_s15 = scalar_lea.vmem %s14_s7, 256  ;;  %p75_p4 = scmp.lt.s32.totalorder %s14_s7, %s14_s7 }
   0x9   :  { %p71_p3 = scmp.ne.s32.totalorder %s14_s7, %s70_s15  ;;  %p76_p5 = scmp.lt.s32.totalorder %s70_s15, %s70_s15 }
   0xb   :  { %p77_p6 = por %p76_p5, %p75_p4 }
   0xd   :  { %p78_p7 = pnand %p77_p6, %p71_p3 }
   0xf   :  { %81 = shalt.err (!%p78_p7)
}
  0x10   :  { %s109_s16 = smov 128   ;;  %s110_s17 = smov 8  }
  0x11   :  { %19 = dma.hbm_to_vmem [thread:$0]  %s152_s0, 256, %s14_s7, [#allocation3], %s109_s16, %s109_s16, %s110_s17  }
  0x12   :  { %104 = dma.done.wait [#allocation3], 256  }
  0x13   :  { %105 = vsyncadd [#allocation3], 4294967040  ;;  %v23_v0 = vld [vmem:[#allocation2] sm:$0xff]  ;;  %v24_v1 = vld [vmem:[#allocation2 + $0x8] sm:$0xff]  ;;  %s111_s20 = smov [#allocation5]  }
  0x14   :  { %v25_v2 = vmul.f32 0.5, %v23_v0  ;;  %v26_v3 = vmul.f32 0.5, %v24_v1  ;;  %s40_s21 = sshll.u32 %s111_s20, 4  ;;  %s41_s21 = int_to_ptr.vmem [resolvable:$true] %s40_s21 }
  0x15   :  { %s82_s0 = scalar_lea.vmem %s41_s21, 256  ;;  %p87_p9 = scmp.lt.s32.totalorder %s41_s21, %s41_s21 }
  0x16   :  { %56 = vtanh.f32 %v25_v2  ;;  %p83_p8 = scmp.ne.s32.totalorder %s41_s21, %s82_s0  ;;  %p88_p10 = scmp.lt.s32.totalorder %s82_s0, %s82_s0 }
  0x17   :  { %58 = vtanh.f32 %v26_v3 }
  0x18   :  { %p89_p11 = por %p88_p10, %p87_p9 }
  0x1a   :  { %p90_p12 = pnand %p89_p11, %p83_p8 }
  0x20   :  { %v57_v4 = vpop.eup %56 }
  0x21   :  { %v59_v5 = vpop.eup %58  ;;  %v29_v6 = vmul.f32 0.9233528, %v57_v4 }
  0x22   :  { %v30_v7 = vmul.f32 0.9233528, %v59_v5 }
  0x23   :  { %v31_v8 = vadd.f32 0.9233528, %v29_v6 }
  0x24   :  { %v32_v9 = vadd.f32 0.9233528, %v30_v7 }
  0x25   :  { %33 = vst [vmem:[#allocation5] sm:$0xff] %v31_v8 }
  0x26   :  { %34 = vst [vmem:[#allocation5 + $0x8] sm:$0xff] %v32_v9 }
  0x27   :  { %93 = shalt.err (!%p90_p12)
}
  0x28   :  { %s94_s24 = scalar_lea.hbm %s153_s1, 256 }
  0x29   :  { %p95_p13 = scmp.ne.s32.totalorder %s153_s1, %s94_s24  ;;  %p98_p0 = scmp.lt.u32.totalorder %s94_s24, %s153_s1 }
  0x2b   :  { %p100_p1 = pnand %p98_p0, %p95_p13 }
  0x2d   :  { %103 = shalt.err (!%p100_p1)
}
  0x2e   :  { %46 = dma.vmem_to_hbm [thread:$0]  %s41_s21, 256, %s153_s1, [#allocation4], %s109_s16, %s109_s16, %s110_s17  }
  0x2f   :  { %106 = dma.done.wait [#allocation4], 256  }
  0x30   :  { %107 = vsyncadd [#allocation4], 4294967040 }
  0x31   :  { %50 = vsyncpa [#allocation3], 1 }
  0x32   :  { %51 = vsyncpa [#allocation4], 1 }

</bundles_post_ra>
